<compile_context>
chip_gen: v7x
topology: tpu7x:2x2x1
jax: 0.10.0
libtpu: 0.0.40
codegen_flags: <defaults>
</compile_context>

<pallas_src>
import functools

import jax
import jax.numpy as jnp
from jax import lax
from jax.experimental import pallas as pl
from jax.experimental.pallas import tpu as pltpu


def _lambda_kernel(x_ref, sel_ref, o_ref, *, b_blk, pad):
    """Option-A shortcut for one batch block.

    x_ref:   (b_blk, C, H*W)          input, spatial flattened (lane-dense)
    sel_ref: (H*W, Ho*Wo)             0/1 selection matrix (stride-2 subsample)
    o_ref:   (b_blk, C + 2*pad, Ho*Wo)
    """
    sel = sel_ref[...]                                    # loaded once per step
    s_out = o_ref.shape[-1]
    zeros_pad = jnp.zeros((pad, s_out), dtype=o_ref.dtype) if pad > 0 else None

    def body(b, carry):
        # (C, H*W) @ (H*W, Ho*Wo) -> (C, Ho*Wo); exact 0/1 selection.
        z = jnp.dot(x_ref[b], sel, preferred_element_type=jnp.float32)
        z = z.astype(o_ref.dtype)
        if pad > 0:
            z = jnp.concatenate([zeros_pad, z, zeros_pad], axis=0)
        o_ref[b] = z                                      # single full store
        return carry

    lax.fori_loop(0, b_blk, body, 0, unroll=(b_blk <= 8))


def lambda_layer(x, planes):
    """Pallas implementation of LambdaLayer wrapping the option-A shortcut lambda."""
    n, c, h, w = x.shape
    pad = planes // 4
    c_out = c + 2 * pad
    ho, wo = (h + 1) // 2, (w + 1) // 2                   # matches x[:, :, ::2, ::2]
    s_in, s_out = h * w, ho * wo

    # Selection matrix: sel[s, k] = 1 iff s == 2*(k // wo)*w + 2*(k % wo).
    # Built once in the wrapper, in the input dtype (exact for 0/1 selection).
    k = jnp.arange(s_out, dtype=jnp.int32)
    src = 2 * (k // wo) * w + 2 * (k % wo)
    s_idx = jnp.arange(s_in, dtype=jnp.int32)
    sel = (s_idx[:, None] == src[None, :]).astype(x.dtype)

    x_flat = x.reshape(n, c, s_in)                        # free, lane-dense layout

    # Batch block: target ~2 MiB input tiles; keep >= 2 grid steps when possible
    # (megacore sharding on v7x); block count divides N (no ragged tail).
    itemsize = x.dtype.itemsize
    bytes_per_sample = max(1, c * s_in * itemsize)
    b_blk = max(1, (2 << 20) // bytes_per_sample)
    b_blk = min(b_blk, n)
    if n >= 2:
        b_blk = min(b_blk, (n + 1) // 2)
    while n % b_blk:
        b_blk -= 1

    kernel = functools.partial(_lambda_kernel, b_blk=b_blk, pad=pad)

    out = pl.pallas_call(
        kernel,
        out_shape=jax.ShapeDtypeStruct((n, c_out, s_out), x.dtype),
        grid_spec=pltpu.PrefetchScalarGridSpec(
            num_scalar_prefetch=0,
            grid=(n // b_blk,),
            in_specs=[
                pl.BlockSpec((b_blk, c, s_in), lambda i: (i, 0, 0)),
                pl.BlockSpec((s_in, s_out), lambda i: (0, 0)),   # resident in VMEM
            ],
            out_specs=pl.BlockSpec((b_blk, c_out, s_out), lambda i: (i, 0, 0)),
        ),
        compiler_params=pltpu.CompilerParams(
            dimension_semantics=("parallel",)),
    )(x_flat, sel)

    return out.reshape(n, c_out, ho, wo)


if __name__ == "__main__":
    key = jax.random.PRNGKey(0)
    N, C, H, W = 2, 4, 16, 16
    planes = 2 * C                      # option-A shortcut typically doubles planes
    x = jax.random.normal(key, (N, C, H, W), dtype=jnp.float32)

    out = jax.block_until_ready(lambda_layer(x, planes))

    # Reference for lambd(x) = F.pad(x[:, :, ::2, ::2], (0,0,0,0,planes//4,planes//4))
    pad = planes // 4
    ref = jnp.pad(x[:, :, ::2, ::2], ((0, 0), (pad, pad), (0, 0), (0, 0)))
    assert out.shape == ref.shape, (out.shape, ref.shape)
    assert jnp.allclose(out, ref, atol=1e-6, rtol=1e-6)
    print("KERNEL_OK")
</pallas_src>

<mosaic_0001>
module attributes {stable_mosaic.version = 11 : i64} {
  func.func @_lambda_kernel(%arg0: i32, %arg1: memref<1x4x256xf32, #tpu.memory_space<vmem>>, %arg2: memref<256x64xf32, #tpu.memory_space<vmem>>, %arg3: memref<1x8x64xf32, #tpu.memory_space<vmem>>) attributes {dimension_semantics = [#tpu.dimension_semantics<parallel>], iteration_bounds = array<i64: 2>, scalar_prefetch = 0 : i64, scratch_operands = 0 : i64, tpu.core_type = #tpu.core_type<tc>, window_params = [{transform_indices = @transform_0, window_bounds = array<i64: 1, 4, 256>}, {pipeline_mode = #tpu.pipeline_mode<synchronous>, transform_indices = @transform_1, window_bounds = array<i64: 256, 64>}, {transform_indices = @transform_2, window_bounds = array<i64: 1, 8, 64>}]} {
    %c0 = arith.constant 0 : index
    %c0_0 = arith.constant 0 : index
    %0 = vector.load %arg2[%c0, %c0_0] : memref<256x64xf32, #tpu.memory_space<vmem>>, vector<256x64xf32>
    %cst = arith.constant 0.000000e+00 : f32
    %1 = vector.broadcast %cst : f32 to vector<2x64xf32>
    %c0_i32 = arith.constant 0 : i32
    %2 = arith.index_cast %c0_i32 : i32 to index
    %c0_1 = arith.constant 0 : index
    %c0_2 = arith.constant 0 : index
    %3 = vector.load %arg1[%2, %c0_1, %c0_2] : memref<1x4x256xf32, #tpu.memory_space<vmem>>, vector<1x4x256xf32>
    %4 = vector.shape_cast %3 : vector<1x4x256xf32> to vector<4x256xf32>
    %cst_3 = arith.constant dense<0.000000e+00> : vector<4x64xf32>
    %5 = tpu.matmul %4, %0, %cst_3 {dimension_numbers = #tpu.dot_dimension_numbers<[1], [0], [0], [1], [0, 0, 1, 1], [], []>} : vector<4x256xf32>, vector<256x64xf32>, vector<4x64xf32> -> vector<4x64xf32>
    %6 = tpu.concatenate %1, %5, %1 in 0 : vector<2x64xf32>, vector<4x64xf32>, vector<2x64xf32> -> vector<8x64xf32>
    %7 = arith.index_cast %c0_i32 : i32 to index
    %c0_4 = arith.constant 0 : index
    %c0_5 = arith.constant 0 : index
    %8 = vector.load %arg3[%7, %c0_4, %c0_5] : memref<1x8x64xf32, #tpu.memory_space<vmem>>, vector<1x8x64xf32>
    %9 = vector.shape_cast %8 : vector<1x8x64xf32> to vector<8x64xf32>
    %10 = vector.shape_cast %6 : vector<8x64xf32> to vector<1x8x64xf32>
    tpu.vector_store %arg3[%7, %c0_4, %c0_5], %10 {strides = array<i32>} : memref<1x8x64xf32, #tpu.memory_space<vmem>>, vector<1x8x64xf32>,
    %c1_i32 = arith.constant 1 : i32
    return
  }
  func.func @transform_0(%arg0: i32) -> (i32, i32, i32) {
    %c0_i32 = arith.constant 0 : i32
    %c0_i32_0 = arith.constant 0 : i32
    %c0_i32_1 = arith.constant 0 : i32
    return %arg0, %c0_i32, %c0_i32_0 : i32, i32, i32
  }
  func.func @transform_1(%arg0: i32) -> (i32, i32) {
    %c0_i32 = arith.constant 0 : i32
    %c0_i32_0 = arith.constant 0 : i32
    %c0_i32_1 = arith.constant 0 : i32
    return %c0_i32, %c0_i32_0 : i32, i32
  }
  func.func @transform_2(%arg0: i32) -> (i32, i32, i32) {
    %c0_i32 = arith.constant 0 : i32
    %c0_i32_0 = arith.constant 0 : i32
    %c0_i32_1 = arith.constant 0 : i32
    return %arg0, %c0_i32, %c0_i32_0 : i32, i32, i32
  }
}

</mosaic_0001>

<bundles_post_ra>
// kernel: tpu_custom_call.1
= control target key start
LH: loop header
LB: loop body
LE: loop exit
PB: predicated region body
PF: predicated region fallthrough
CT: control target
= control target key end

     0   :  { %7 = vsyncpa [#allocation3], 0  ;;  %s725_s0 = inlined_call_operand.vmem [shape: f32[2,4,256], index: 0, kind: input, shape index: {}]   ;;  %s726_s1 = inlined_call_operand.vmem [shape: f32[256,64], index: 1, kind: input, shape index: {}]   ;;  %s727_s2 = inlined_call_operand.hbm [shape: f32[2,8,64], index: 2, kind: output, shape index: {}]  }
   0x1   :  { %9 = vsyncpa [#allocation3 + $0x1], 0  ;;  %s529_s9 = smov 0   ;;  %s531_s10 = smov 0  }
   0x2   :  { %s533_s11 = smov 0   ;;  %s535_s12 = smov 0  }
   0x3 LB: > { %s550_s13 = sadd.s32 4294967295, %s511_s12   ;;  %s330_s14 = sadd.s32 4294967294, %s511_s12   ;;  %s511_s12 = sphi %s535_s12, %s733_s12   ;;  %s507_s11 = sphi %s533_s11, %s732_s11   ;;  %s503_s10 = sphi %s531_s10, %s731_s10   ;;  %s499_s9 = sphi %s529_s9, %s730_s9  }
   0x4   : > { %s554_s15 = sadd.s32 1, %s511_s12   ;;  %s69_s16 = sadd.s32 1, %s507_s11 }
   0x5   : > { %s66_s17 = ssub.s32 %s511_s12, %s554_s15  ;;  %p79_p0 = scmp.ne.s32.totalorder %s507_s11, %s503_s10 }
   0x6   : > { %p67_p1 = scmp.eq.s32.totalorder %s66_s17, 0  ;;  %p80_p2 = scmp.eq.s32.totalorder %s550_s13, 1 }
   0x7   : > { %p85_p3 = scmp.ne.s32.totalorder %s503_s10, %s499_s9  ;;  %p86_p4 = scmp.eq.s32.totalorder %s330_s14, 1 }
   0x8   : > { %s565_s18 = scalar_select %p67_p1, %s507_s11, %s69_s16  }
   0x9   : > { %p567_p5 = por %p80_p2, %p79_p0  ;;  %p571_p6 = por %p86_p4, %p85_p3 }
   0xa   : > { %p333_p7 = scmp.ge.s32.totalorder %s511_s12, 1  ;;  %p115_p8 = scmp.lt.s32.totalorder %s511_s12, 3 }
   0xc   : > { %p116_p9 = pnand %p333_p7, %p115_p8 }
   0xd   : > { %v158_v0 = vld [vmem:[%s726_s1 + $0x80] sm:$0xff] (!%p116_p9)  ;;  %v159_v1 = vld [vmem:[%s726_s1 + $0x88] sm:$0xff] (!%p116_p9)  ;;  %p137_p10 = scmp.lt.s32.totalorder (!%p116_p9), %s550_s13, 1  ;;  %v160_v5 = vld [vmem:[%s726_s1 + $0x90] sm:$0xff] (!%p116_p9)  ;;  %s134_s5 = sand.u32 (!%p116_p9), 1, %s503_s10   ;;  %vm251_vm0 = vcmask (!%p116_p9), 1041408  }
   0xe   : > { %119 = sbr.rel (%p116_p9) target bundleno = 281 (0x119), region = 28  ;;  %v142_v2 = vld [vmem:[%s726_s1] sm:$0xff] (!%p116_p9)  ;;  %v377_v3 = vpack.c.bf16 (!%p116_p9), %v159_v1, %v158_v0  ;;  %v143_v4 = vld [vmem:[%s726_s1 + $0x8] sm:$0xff] (!%p116_p9)  ;;  %v161_v6 = vld [vmem:[%s726_s1 + $0x98] sm:$0xff] (!%p116_p9)  ;;  %s338_s7 = sshll.u32 (!%p116_p9), %s550_s13, 7  ;;  %vm253_vm1 = vcmask (!%p116_p9), 1045504  }
   0xf   : > { %v379_v7 = vpack.c.bf16 (!%p116_p9), %v143_v4, %v142_v2  ;;  %v381_v8 = vpack.c.bf16 (!%p116_p9), %v161_v6, %v160_v5  ;;  %v144_v9 = vld [vmem:[%s726_s1 + $0x10] sm:$0xff] (!%p116_p9)  ;;  %v145_v10 = vld [vmem:[%s726_s1 + $0x18] sm:$0xff] (!%p116_p9)  ;;  %v162_v11 = vld [vmem:[%s726_s1 + $0xa0] sm:$0xff] (!%p116_p9)  ;;  %vm255_vm2 = vcmask (!%p116_p9), 523264   ;;  %s683_s21 = scalar_lea.hbm (!%p116_p9), %s727_s2, %s338_s7  ;;  %s258_s22 = scalar_lea.sflag (!%p116_p9), [#allocation3], %s134_s5 }
  0x10   : > { %378 = vmatprep.subr.bf16.mxu0 (!%p116_p9), %v377_v3  ;;  %v163_v12 = vld [vmem:[%s726_s1 + $0xa8] sm:$0xff] (!%p116_p9)  ;;  %v383_v13 = vpack.c.bf16 (!%p116_p9), %v145_v10, %v144_v9  ;;  %v146_v15 = vld [vmem:[%s726_s1 + $0x20] sm:$0xff] (!%p116_p9)  ;;  %v164_v17 = vld [vmem:[%s726_s1 + $0xb0] sm:$0xff] (!%p116_p9)  ;;  %s513_s24 = smov (!%p116_p9), [#allocation2]  }
  0x11   : > { %380 = vmatpush3.bf16.msra.mxu0 (!%p116_p9), %v379_v7  ;;  %v385_v14 = vpack.c.bf16 (!%p116_p9), %v163_v12, %v162_v11  ;;  %v147_v16 = vld [vmem:[%s726_s1 + $0x28] sm:$0xff] (!%p116_p9)  ;;  %v165_v18 = vld [vmem:[%s726_s1 + $0xb8] sm:$0xff] (!%p116_p9)  ;;  %v148_v21 = vld [vmem:[%s726_s1 + $0x30] sm:$0xff] (!%p116_p9) }
  0x12   : > { %382 = vmatprep.subr.bf16.mxu0 (!%p116_p9), %v381_v8  ;;  %v387_v19 = vpack.c.bf16 (!%p116_p9), %v147_v16, %v146_v15  ;;  %v389_v20 = vpack.c.bf16 (!%p116_p9), %v165_v18, %v164_v17  ;;  %v149_v22 = vld [vmem:[%s726_s1 + $0x38] sm:$0xff] (!%p116_p9)  ;;  %v166_v23 = vld [vmem:[%s726_s1 + $0xc0] sm:$0xff] (!%p116_p9)  ;;  %v167_v24 = vld [vmem:[%s726_s1 + $0xc8] sm:$0xff] (!%p116_p9) }
  0x13   : > { %v391_v27 = vpack.c.bf16 (!%p116_p9), %v149_v22, %v148_v21  ;;  %v393_v28 = vpack.c.bf16 (!%p116_p9), %v167_v24, %v166_v23  ;;  %v150_v29 = vld [vmem:[%s726_s1 + $0x40] sm:$0xff] (!%p116_p9)  ;;  %v151_v30 = vld [vmem:[%s726_s1 + $0x48] sm:$0xff] (!%p116_p9)  ;;  %v168_v31 = vld [vmem:[%s726_s1 + $0xd0] sm:$0xff] (!%p116_p9) }
  0x14   : > { %v169_v32 = vld [vmem:[%s726_s1 + $0xd8] sm:$0xff] (!%p116_p9)  ;;  %v395_v33 = vpack.c.bf16 (!%p116_p9), %v151_v30, %v150_v29  ;;  %v152_v35 = vld [vmem:[%s726_s1 + $0x50] sm:$0xff] (!%p116_p9)  ;;  %v170_v37 = vld [vmem:[%s726_s1 + $0xe0] sm:$0xff] (!%p116_p9) }
  0x15   : > { %s138_s17 = scalar_select %p137_p10, %s550_s13, 1  ;;  %384 = vmatpush3.bf16.msra.mxu0 %v383_v13  ;;  %v397_v34 = vpack.c.bf16 %v169_v32, %v168_v31  ;;  %v153_v36 = vld [vmem:[%s726_s1 + $0x58] sm:$0xff]  ;;  %v171_v38 = vld [vmem:[%s726_s1 + $0xe8] sm:$0xff]  ;;  %v154_v41 = vld [vmem:[%s726_s1 + $0x60] sm:$0xff] }
  0x16   : > { %386 = vmatprep.subr.bf16.mxu0 %v385_v14  ;;  %v399_v39 = vpack.c.bf16 %v153_v36, %v152_v35  ;;  %v401_v40 = vpack.c.bf16 %v171_v38, %v170_v37  ;;  %v155_v42 = vld [vmem:[%s726_s1 + $0x68] sm:$0xff]  ;;  %v172_v43 = vld [vmem:[%s726_s1 + $0xf0] sm:$0xff]  ;;  %v173_v44 = vld [vmem:[%s726_s1 + $0xf8] sm:$0xff] }
  0x17   : > { %s341_s23 = sshll.u32 %s138_s17, 3  ;;  %v403_v45 = vpack.c.bf16 %v155_v42, %v154_v41  ;;  %v405_v46 = vpack.c.bf16 %v173_v44, %v172_v43  ;;  %v156_v47 = vld [vmem:[%s726_s1 + $0x70] sm:$0xff]  ;;  %v157_v48 = vld [vmem:[%s726_s1 + $0x78] sm:$0xff] }
  0x18   : > { %s141_s6 = scalar_lea.vmem %s725_s0, %s341_s23  ;;  %v407_v49 = vpack.c.bf16 %v157_v48, %v156_v47  ;;  %s453_s23 = sshll.u32 %s513_s24, 4  ;;  %s454_s23 = int_to_ptr.vmem [resolvable:$false] %s453_s23 }
  0x19   : > { %v174_v25 = vld [vmem:[%s141_s6] sm:$0xff]  ;;  %388 = vmatpush3.bf16.msra.mxu0 %v387_v19  ;;  %s334_s6 = sshll.u32 %s134_s5, 3  ;;  %s455_s25 = scalar_lea.vmem %s454_s23, 256 }
  0x1a   : > { %v176_v26 = vcombine.high %v174_v25, %v174_v25  ;;  %390 = vmatprep.subr.bf16.mxu0 %v389_v20  ;;  %s136_s8 = scalar_lea.vmem [#allocation2], %s334_s6 }
  0x1b   : > { %s271_s14 = sshll.u32 %s136_s8, 4  ;;  %s685_s14 = int_to_ptr.vmem [resolvable:$true] %s271_s14 }
  0x1c   : > { %242 = vmatprep.mubr.f32.mxu0 %v176_v26  ;;  %s449_s13 = scalar_lea.vmem %s685_s14, 128  ;;  %p456_p0 = scmp.lt.s32.totalorder %s685_s14, %s454_s23 }
  0x1d   : > { %392 = vmatpush3.bf16.msra.mxu0 %v391_v27  ;;  %p450_p11 = scmp.ne.s32.totalorder %s685_s14, %s449_s13  ;;  %p457_p1 = scmp.lt.s32.totalorder %s455_s25, %s449_s13 }
  0x1e   : > { %394 = vmatprep.subr.bf16.mxu0 %v393_v28 }
  0x1f   : > { %p451_p12 = pnand %p450_p11, %p567_p5  ;;  %p458_p2 = por %p457_p1, %p456_p0 }
  0x21   : > { %396 = vmatpush3.bf16.msra.mxu0 %v395_v33  ;;  %p452_p13 = pneg %p451_p12 }
  0x22   : > { %398 = vmatprep.subr.bf16.mxu0 %v397_v34 }
  0x23   : > { %p459_p3 = pnand %p458_p2, %p452_p13 }
  0x25   : > { %400 = vmatpush3.bf16.msra.mxu0 %v399_v39 }
  0x26   : > { %402 = vmatprep.subr.bf16.mxu0 %v401_v40 }
  0x29   : > { %404 = vmatpush3.bf16.msra.mxu0 %v403_v45 }
  0x2a   : > { %406 = vmatprep.subr.bf16.mxu0 %v405_v46 }
  0x2d   : > { %408 = vmatpush3.bf16.msra.mxu0 %v407_v49 }
  0x30   : > { %243 = vmatmul.mubr.f32.vlgmr.msra.gmra.mrb[0].mxu0 %v174_v25 }
 0x103   : > { %v374_v50 = vpop.f32.mrb[0].mxu0 }
 0x104   : > { %v375_v51 = vpop.f32.mrb[1].mxu0 }
 0x105   : > { %v376_v52 = vadd.f32 %v375_v51, %v374_v50 }
 0x107   : > { %v249_v53 = vrot.slane %v376_v52, 6 }
 0x109   : > { %v252_v54 = vsel %vm251_vm0, 0.0, %v249_v53 }
 0x10a   : > { %v254_v55 = vsel %vm253_vm1, %v252_v54, 0.0 }
 0x10b   : > { %256 = vst.msk [vmem:[%s136_s8] sm:$0xff] %vm255_vm2, %v254_v55 }
 0x10c   : > { %462 = shalt.err (!%p459_p3)
}
 0x10d   : > { %s463_s26 = scalar_lea.hbm %s683_s21, 128  ;;  %s467_s29 = scalar_lea.hbm %s727_s2, 256 }
 0x10e   : > { %p464_p4 = scmp.ne.s32.totalorder %s683_s21, %s463_s26  ;;  %p468_p9 = scmp.lt.u32.totalorder %s683_s21, %s727_s2 }
 0x10f   : > { %p469_p10 = scmp.lt.u32.totalorder %s467_s29, %s463_s26  ;;  %p471_p12 = scmp.lt.u32.totalorder %s463_s26, %s683_s21 }
 0x110   : > { %p465_p7 = pnand %p464_p4, %p567_p5 }
 0x111   : > { %p470_p11 = por %p469_p10, %p468_p9 }
 0x112   : > { %p466_p8 = pneg %p465_p7 }
 0x113   : > { %p472_p13 = por %p471_p12, %p470_p11 }
 0x115   : > { %p473_p0 = pnand %p472_p13, %p466_p8 }
 0x117   : > { %476 = shalt.err (!%p473_p0)
}
 0x118   : > { %409 = dma.vmem_to_hbm [thread:$0]  (%p567_p5), %s685_s14, 128, %s683_s21, %s258_s22  }
 0x119 PF: > { %p415_p1 = scmp.ge.s32.totalorder %s511_s12, 2  ;;  %s283_s4 = sand.u32 1, %s499_s9  }
 0x11a   : > { %s284_s5 = scalar_lea.sflag [#allocation3], %s283_s4 }
 0x11b   : > { %p412_p2 = pnand %p415_p1, %p571_p6 }
 0x11d   : > { %494 = dma.done.wait (!%p412_p2), %s284_s5, 128  }
 0x11e   : > { %496 = vsyncadd (!%p412_p2), %s284_s5, 4294967168  ;;  %p12_p3 = scmp.ge.s32.totalorder %s554_s15, 4   ;;  %s730_s9 = smov %s503_s10 }
 0x11f   : > { %s731_s10 = smov %s507_s11  ;;  %s732_s11 = smov %s565_s18 }
 0x120   : > { %s733_s12 = smov %s554_s15  ;;  %14 = sbr.rel (!%p12_p3) target bundleno = 3 (0x3), region = 63 }
 0x127   :  { %289 = vsyncpa [#allocation3], 1 }
 0x128   :  { %291 = vsyncpa [#allocation3 + $0x1], 1 }

</bundles_post_ra>
